<compile_context>
chip_gen: v7x
topology: tpu7x:2x2x1
jax: 0.10.0
libtpu: 0.0.40
codegen_flags: <defaults>
</compile_context>

<pallas_src>
import jax
import jax.numpy as jnp
from jax.experimental import pallas as pl
from jax.experimental.pallas import tpu as pltpu


def _gated_fusion_kernel(img_ref, txt_ref, w1_ref, b1_ref, w2_ref, b2_ref,
                         out_ref):
    img = img_ref[...]                       # [TB, D]
    txt = txt_ref[...]                       # [TB, D]
    d = img.shape[1]

    # First Linear with the concat folded away:
    #   cat([img, txt]) @ W1 == img @ W1[:D] + txt @ W1[D:]
    # Static ref slices are zero-cost views; both matmuls hit the MXU.
    h = jnp.dot(img, w1_ref[:d, :], preferred_element_type=jnp.float32)
    h = h + jnp.dot(txt, w1_ref[d:, :], preferred_element_type=jnp.float32)
    h = jnp.maximum(h + b1_ref[...], 0.0)    # [TB, H] f32, ReLU

    # Second Linear has output width 1 -> do it on the VPU (mul) + XLU (lane
    # reduce) instead of an N=1 MXU matmul. w2_ref is W2 reshaped to [1, H].
    logit = jnp.sum(h * w2_ref[...], axis=-1, keepdims=True) + b2_ref[0]
    alpha = jax.nn.sigmoid(logit)            # [TB, 1] f32

    # alpha*img + (1-alpha)*txt == txt + alpha*(img - txt)   (3 VPU ops, not 4)
    out_ref[...] = (txt + alpha * (img - txt)).astype(out_ref.dtype)


def _choose_tile_b(batch, d, h, itemsize, budget_bytes=16 * 1024 * 1024):
    """Largest batch tile (multiple of 8) whose pipelined VMEM footprint fits
    a conservative budget that also works on v7x's 64 MiB VMEM."""
    # Per-row cost: img/txt/out streams x 2 pipeline buffers + f32 temporaries.
    per_row = 3 * 2 * d * itemsize + (d + h + 1) * 4
    tb = budget_bytes // max(per_row, 1)
    if tb >= batch:
        return batch                          # single full block (no padding rules)
    return min(batch, max(8, (tb // 8) * 8))  # keep sublane (8) alignment


def gated_attention_fusion(img_feat, txt_feat, w1, b1, w2, b2, *, tile_b=None):
    """img_feat, txt_feat: [B, D]; w1: [2D, H]; b1: [H]; w2: [H, 1]; b2: [1]."""
    B, D = img_feat.shape
    H = w1.shape[1]
    assert w1.shape == (2 * D, H)

    if tile_b is None:
        tile_b = _choose_tile_b(B, D, H, img_feat.dtype.itemsize)
    tb = int(tile_b)

    b1_row = b1.reshape(1, H)                 # broadcast row for the hidden bias
    w2_row = w2.reshape(1, H)                 # column vector as a lane-dense row
    b2_s = b2.reshape(1).astype(jnp.float32)  # scalar -> SMEM

    data_map = lambda i: (i, 0)               # tiles march down the batch axis
    const_map = lambda i: (0, 0)              # weights stay resident

    return pl.pallas_call(
        _gated_fusion_kernel,
        out_shape=jax.ShapeDtypeStruct((B, D), img_feat.dtype),
        grid_spec=pltpu.PrefetchScalarGridSpec(
            num_scalar_prefetch=0,
            grid=(pl.cdiv(B, tb),),
            in_specs=[
                pl.BlockSpec((tb, D), data_map),              # img tile
                pl.BlockSpec((tb, D), data_map),              # txt tile
                pl.BlockSpec((2 * D, H), const_map),          # W1 (whole)
                pl.BlockSpec((1, H), const_map),              # b1 row
                pl.BlockSpec((1, H), const_map),              # W2 as a row
                pl.BlockSpec(memory_space=pltpu.MemorySpace.SMEM),  # b2 scalar
            ],
            out_specs=pl.BlockSpec((tb, D), data_map),
        ),
        compiler_params=pltpu.CompilerParams(
            dimension_semantics=("parallel",),        # shard tiles across TCs (v7x)
            vmem_limit_bytes=48 * 1024 * 1024,        # headroom, < v7x physical
        ),
    )(img_feat, txt_feat, w1, b1_row, w2_row, b2_s)


def _reference(img, txt, w1, b1, w2, b2):
    fused_in = jnp.concatenate([img, txt], axis=-1)
    h = jnp.maximum(fused_in @ w1 + b1, 0.0)
    alpha = jax.nn.sigmoid(h @ w2 + b2)
    return alpha * img + (1.0 - alpha) * txt


if __name__ == "__main__":
    # Small shapes consistent with the module's forward (img/txt are [B, D]).
    B, D, H = 32, 128, 64

    key = jax.random.PRNGKey(0)
    k_img, k_txt, k_w1, k_b1, k_w2, k_b2 = jax.random.split(key, 6)

    img_feat = jax.random.normal(k_img, (B, D), dtype=jnp.float32)
    txt_feat = jax.random.normal(k_txt, (B, D), dtype=jnp.float32)

    # Parameter shapes from nn.Linear(2D, H) and nn.Linear(H, 1).
    w1 = jax.random.normal(k_w1, (2 * D, H), dtype=jnp.float32) * 0.05
    b1 = jax.random.normal(k_b1, (H,), dtype=jnp.float32) * 0.05
    w2 = jax.random.normal(k_w2, (H, 1), dtype=jnp.float32) * 0.05
    b2 = jax.random.normal(k_b2, (1,), dtype=jnp.float32) * 0.05

    ref = _reference(img_feat, txt_feat, w1, b1, w2, b2)

    # Exercise the tiled / pipelined path explicitly (grid=(2,)).
    out = gated_attention_fusion(img_feat, txt_feat, w1, b1, w2, b2, tile_b=16)
    out = jax.block_until_ready(out)
    assert out.shape == (B, D)
    assert jnp.allclose(out, ref, atol=1e-5, rtol=1e-5), "mismatch (tiled path)"

    # Also exercise the auto tile-size path (single full block at these shapes).
    out2 = jax.block_until_ready(
        gated_attention_fusion(img_feat, txt_feat, w1, b1, w2, b2))
    assert jnp.allclose(out2, ref, atol=1e-5, rtol=1e-5), "mismatch (auto tile)"

    print("KERNEL_OK")
</pallas_src>

<mosaic_0001>
module attributes {stable_mosaic.version = 11 : i64} {
  func.func @_gated_fusion_kernel(%arg0: i32, %arg1: memref<16x128xf32, #tpu.memory_space<vmem>>, %arg2: memref<16x128xf32, #tpu.memory_space<vmem>>, %arg3: memref<256x64xf32, #tpu.memory_space<vmem>>, %arg4: memref<1x64xf32, #tpu.memory_space<vmem>>, %arg5: memref<1x64xf32, #tpu.memory_space<vmem>>, %arg6: memref<1xf32, #tpu.memory_space<smem>>, %arg7: memref<16x128xf32, #tpu.memory_space<vmem>>) attributes {dimension_semantics = [#tpu.dimension_semantics<parallel>], iteration_bounds = array<i64: 2>, scalar_prefetch = 0 : i64, scratch_operands = 0 : i64, tpu.core_type = #tpu.core_type<tc>, window_params = [{transform_indices = @transform_0, window_bounds = array<i64: 16, 128>}, {transform_indices = @transform_1, window_bounds = array<i64: 16, 128>}, {pipeline_mode = #tpu.pipeline_mode<synchronous>, transform_indices = @transform_2, window_bounds = array<i64: 256, 64>}, {pipeline_mode = #tpu.pipeline_mode<synchronous>, transform_indices = @transform_3, window_bounds = array<i64: 1, 64>}, {pipeline_mode = #tpu.pipeline_mode<synchronous>, transform_indices = @transform_4, window_bounds = array<i64: 1, 64>}, {transform_indices = @transform_5, window_bounds = array<i64: 1>}, {transform_indices = @transform_6, window_bounds = array<i64: 16, 128>}]} {
    %c0 = arith.constant 0 : index
    %c0_0 = arith.constant 0 : index
    %0 = vector.load %arg1[%c0, %c0_0] : memref<16x128xf32, #tpu.memory_space<vmem>>, vector<16x128xf32>
    %c0_1 = arith.constant 0 : index
    %c0_2 = arith.constant 0 : index
    %1 = vector.load %arg2[%c0_1, %c0_2] : memref<16x128xf32, #tpu.memory_space<vmem>>, vector<16x128xf32>
    %c0_3 = arith.constant 0 : index
    %c0_4 = arith.constant 0 : index
    %2 = vector.load %arg3[%c0_3, %c0_4] : memref<256x64xf32, #tpu.memory_space<vmem>>, vector<128x64xf32>
    %cst = arith.constant dense<0.000000e+00> : vector<16x64xf32>
    %3 = tpu.matmul %0, %2, %cst {dimension_numbers = #tpu.dot_dimension_numbers<[1], [0], [0], [1], [0, 0, 1, 1], [], []>} : vector<16x128xf32>, vector<128x64xf32>, vector<16x64xf32> -> vector<16x64xf32>
    %c128 = arith.constant 128 : index
    %c0_5 = arith.constant 0 : index
    %4 = vector.load %arg3[%c128, %c0_5] : memref<256x64xf32, #tpu.memory_space<vmem>>, vector<128x64xf32>
    %cst_6 = arith.constant dense<0.000000e+00> : vector<16x64xf32>
    %5 = tpu.matmul %1, %4, %cst_6 {dimension_numbers = #tpu.dot_dimension_numbers<[1], [0], [0], [1], [0, 0, 1, 1], [], []>} : vector<16x128xf32>, vector<128x64xf32>, vector<16x64xf32> -> vector<16x64xf32>
    %6 = arith.addf %3, %5 : vector<16x64xf32>
    %c0_7 = arith.constant 0 : index
    %c0_8 = arith.constant 0 : index
    %7 = vector.load %arg4[%c0_7, %c0_8] : memref<1x64xf32, #tpu.memory_space<vmem>>, vector<1x64xf32>
    %8 = vector.broadcast %7 : vector<1x64xf32> to vector<16x64xf32>
    %9 = arith.addf %6, %8 : vector<16x64xf32>
    %cst_9 = arith.constant 0.000000e+00 : f32
    %10 = vector.broadcast %cst_9 : f32 to vector<16x64xf32>
    %11 = arith.maximumf %9, %10 : vector<16x64xf32>
    %c0_10 = arith.constant 0 : index
    %c0_11 = arith.constant 0 : index
    %12 = vector.load %arg5[%c0_10, %c0_11] : memref<1x64xf32, #tpu.memory_space<vmem>>, vector<1x64xf32>
    %13 = vector.broadcast %12 : vector<1x64xf32> to vector<16x64xf32>
    %14 = arith.mulf %11, %13 : vector<16x64xf32>
    %cst_12 = arith.constant dense<0.000000e+00> : vector<16xf32>
    %15 = vector.multi_reduction <add>, %14, %cst_12 [1] : vector<16x64xf32> to vector<16xf32>
    %16 = vector.shape_cast %15 : vector<16xf32> to vector<16x1xf32>
    %c0_13 = arith.constant 0 : index
    %17 = memref.load %arg6[%c0_13] : memref<1xf32, #tpu.memory_space<smem>>
    %18 = vector.broadcast %17 : f32 to vector<16x1xf32>
    %19 = arith.addf %16, %18 : vector<16x1xf32>
    %20 = arith.negf %19 : vector<16x1xf32>
    %21 = math.exp %20 : vector<16x1xf32>
    %cst_14 = arith.constant 1.000000e+00 : f32
    %22 = vector.broadcast %cst_14 : f32 to vector<16x1xf32>
    %23 = arith.addf %22, %21 : vector<16x1xf32>
    %24 = arith.divf %22, %23 : vector<16x1xf32>
    %25 = arith.subf %0, %1 : vector<16x128xf32>
    %26 = vector.broadcast %24 : vector<16x1xf32> to vector<16x128xf32>
    %27 = arith.mulf %26, %25 : vector<16x128xf32>
    %28 = arith.addf %1, %27 : vector<16x128xf32>
    %c0_15 = arith.constant 0 : index
    %c0_16 = arith.constant 0 : index
    %29 = vector.load %arg7[%c0_15, %c0_16] : memref<16x128xf32, #tpu.memory_space<vmem>>, vector<16x128xf32>
    tpu.vector_store %arg7[%c0_15, %c0_16], %28 {strides = array<i32>} : memref<16x128xf32, #tpu.memory_space<vmem>>, vector<16x128xf32>,
    return
  }
  func.func @transform_0(%arg0: i32) -> (i32, i32) {
    %c0_i32 = arith.constant 0 : i32
    %c0_i32_0 = arith.constant 0 : i32
    return %arg0, %c0_i32 : i32, i32
  }
  func.func @transform_1(%arg0: i32) -> (i32, i32) {
    %c0_i32 = arith.constant 0 : i32
    %c0_i32_0 = arith.constant 0 : i32
    return %arg0, %c0_i32 : i32, i32
  }
  func.func @transform_2(%arg0: i32) -> (i32, i32) {
    %c0_i32 = arith.constant 0 : i32
    %c0_i32_0 = arith.constant 0 : i32
    %c0_i32_1 = arith.constant 0 : i32
    return %c0_i32, %c0_i32_0 : i32, i32
  }
  func.func @transform_3(%arg0: i32) -> (i32, i32) {
    %c0_i32 = arith.constant 0 : i32
    %c0_i32_0 = arith.constant 0 : i32
    %c0_i32_1 = arith.constant 0 : i32
    return %c0_i32, %c0_i32_0 : i32, i32
  }
  func.func @transform_4(%arg0: i32) -> (i32, i32) {
    %c0_i32 = arith.constant 0 : i32
    %c0_i32_0 = arith.constant 0 : i32
    %c0_i32_1 = arith.constant 0 : i32
    return %c0_i32, %c0_i32_0 : i32, i32
  }
  func.func @transform_5(%arg0: i32) -> i32 {
    %c0_i32 = arith.constant 0 : i32
    %c0_i32_0 = arith.constant 0 : i32
    return %c0_i32 : i32
  }
  func.func @transform_6(%arg0: i32) -> (i32, i32) {
    %c0_i32 = arith.constant 0 : i32
    %c0_i32_0 = arith.constant 0 : i32
    return %arg0, %c0_i32 : i32, i32
  }
}

</mosaic_0001>

<bundles_post_ra>
// kernel: tpu_custom_call.1
= control target key start
LH: loop header
LB: loop body
LE: loop exit
PB: predicated region body
PF: predicated region fallthrough
CT: control target
= control target key end

     0   :  { %s1170_s0 = inlined_call_operand.vmem [shape: f32[32,128], index: 0, kind: input, shape index: {}]   ;;  %s1171_s1 = inlined_call_operand.vmem [shape: f32[32,128], index: 1, kind: input, shape index: {}]   ;;  %s1172_s2 = inlined_call_operand.vmem [shape: f32[256,64], index: 2, kind: input, shape index: {}]   ;;  %s1173_s3 = inlined_call_operand.vmem [shape: f32[1,64], index: 3, kind: input, shape index: {}]   ;;  %s1174_s4 = inlined_call_operand.vmem [shape: f32[1,64], index: 4, kind: input, shape index: {}]   ;;  %s1175_s5 = inlined_call_operand.<no memory space> [shape: f32[1], index: 5, kind: input, shape index: {}]   ;;  %s1176_s6 = inlined_call_operand.hbm [shape: f32[32,128], index: 6, kind: output, shape index: {}]  }
   0x1   :  { %11 = sst [smem:[#allocation2]] %s1175_s5 }
   0x2   :  { %12 = vsyncpa [#allocation4], 0 }
   0x3   :  { %14 = vsyncpa [#allocation4 + $0x1], 0  ;;  %s946_s23 = smov 0   ;;  %s948_s24 = smov 0  }
   0x4   :  { %s950_s25 = smov 0   ;;  %s952_s26 = smov 0  }
   0x5 LB: > { %s967_s5 = sadd.s32 4294967295, %s903_s26   ;;  %s601_s27 = sadd.s32 4294967294, %s903_s26   ;;  %s903_s26 = sphi %s952_s26, %s1182_s26   ;;  %s899_s25 = sphi %s950_s25, %s1181_s25   ;;  %s895_s24 = sphi %s948_s24, %s1180_s24   ;;  %s891_s23 = sphi %s946_s23, %s1179_s23  }
   0x6   : > { %s971_s28 = sadd.s32 1, %s903_s26   ;;  %s163_s29 = sadd.s32 1, %s899_s25 }
   0x7   : > { %s160_s30 = ssub.s32 %s903_s26, %s971_s28  ;;  %p173_p0 = scmp.ne.s32.totalorder %s899_s25, %s895_s24 }
   0x8   : > { %p161_p1 = scmp.eq.s32.totalorder %s160_s30, 0  ;;  %p174_p2 = scmp.eq.s32.totalorder %s967_s5, 1 }
   0x9   : > { %p179_p3 = scmp.ne.s32.totalorder %s895_s24, %s891_s23  ;;  %p180_p4 = scmp.eq.s32.totalorder %s601_s27, 1 }
   0xa   : > { %s982_s7 = scalar_select %p161_p1, %s899_s25, %s163_s29  }
   0xb   : > { %p984_p5 = por %p174_p2, %p173_p0  ;;  %p988_p6 = por %p180_p4, %p179_p3 }
   0xc   : > { %p604_p7 = scmp.ge.s32.totalorder %s903_s26, 1  ;;  %p228_p8 = scmp.lt.s32.totalorder %s903_s26, 3 }
   0xe   : > { %p229_p9 = pnand %p604_p7, %p228_p8 }
   0xf   : > { %v296_v0 = vld [vmem:[%s1172_s2 + $0x80] sm:$0xff] (!%p229_p9)  ;;  %v297_v1 = vld [vmem:[%s1172_s2 + $0x88] sm:$0xff] (!%p229_p9)  ;;  %s606_s16 = sshll.u32 (!%p229_p9), %s967_s5, 1  ;;  %v298_v5 = vld [vmem:[%s1172_s2 + $0x90] sm:$0xff] (!%p229_p9)  ;;  %vm482_vm0 = vcmask (!%p229_p9), 523264   ;;  %s619_s12 = sshll.u32 (!%p229_p9), %s967_s5, 8 }
  0x10   : > { %232 = sbr.rel (%p229_p9) target bundleno = 466 (0x1d2), region = 44  ;;  %v280_v2 = vld [vmem:[%s1172_s2] sm:$0xff] (!%p229_p9)  ;;  %v726_v3 = vpack.c.bf16 (!%p229_p9), %v297_v1, %v296_v0  ;;  %v281_v4 = vld [vmem:[%s1172_s2 + $0x8] sm:$0xff] (!%p229_p9)  ;;  %v299_v6 = vld [vmem:[%s1172_s2 + $0x98] sm:$0xff] (!%p229_p9)  ;;  %p264_p10 = scmp.lt.s32.totalorder (!%p229_p9), %s606_s16, 3 }
  0x11   : > { %v758_v7 = vpack.c.bf16 (!%p229_p9), %v281_v4, %v280_v2  ;;  %v730_v8 = vpack.c.bf16 (!%p229_p9), %v299_v6, %v298_v5  ;;  %v282_v9 = vld [vmem:[%s1172_s2 + $0x10] sm:$0xff] (!%p229_p9)  ;;  %v283_v10 = vld [vmem:[%s1172_s2 + $0x18] sm:$0xff] (!%p229_p9)  ;;  %v300_v11 = vld [vmem:[%s1172_s2 + $0xa0] sm:$0xff] (!%p229_p9)  ;;  %s1125_s19 = scalar_lea.hbm (!%p229_p9), %s1176_s6, %s619_s12  ;;  %s905_s22 = smov (!%p229_p9), [#allocation3]  }
  0x12   : > { %727 = vmatprep.subr.bf16.mxu1 (!%p229_p9), %v726_v3  ;;  %v762_v12 = vpack.c.bf16 (!%p229_p9), %v283_v10, %v282_v9  ;;  %v301_v13 = vld [vmem:[%s1172_s2 + $0xa8] sm:$0xff] (!%p229_p9)  ;;  %v284_v14 = vld [vmem:[%s1172_s2 + $0x20] sm:$0xff] (!%p229_p9)  ;;  %v302_v18 = vld [vmem:[%s1172_s2 + $0xb0] sm:$0xff] (!%p229_p9)  ;;  %s845_s27 = sshll.u32 (!%p229_p9), %s905_s22, 4  ;;  %s846_s27 = int_to_ptr.vmem [resolvable:$false] %s845_s27 }
  0x13   : > { %v285_v15 = vld [vmem:[%s1172_s2 + $0x28] sm:$0xff] (!%p229_p9)  ;;  %759 = vmatprep.subr.bf16.mxu0 (!%p229_p9), %v758_v7  ;;  %729 = vmatpush3.bf16.msra.mxu1 (!%p229_p9), %v726_v3  ;;  %v734_v16 = vpack.c.bf16 (!%p229_p9), %v301_v13, %v300_v11  ;;  %v303_v19 = vld [vmem:[%s1172_s2 + $0xb8] sm:$0xff] (!%p229_p9)  ;;  %v286_v20 = vld [vmem:[%s1172_s2 + $0x30] sm:$0xff] (!%p229_p9)  ;;  %s847_s29 = scalar_lea.vmem (!%p229_p9), %s846_s27, 512 }
  0x14   : > { %761 = vmatpush3.bf16.msra.mxu0 (!%p229_p9), %v758_v7  ;;  %731 = vmatprep.subr.bf16.mxu1 (!%p229_p9), %v730_v8  ;;  %v766_v17 = vpack.c.bf16 (!%p229_p9), %v285_v15, %v284_v14  ;;  %v287_v21 = vld [vmem:[%s1172_s2 + $0x38] sm:$0xff] (!%p229_p9)  ;;  %v738_v22 = vpack.c.bf16 (!%p229_p9), %v303_v19, %v302_v18  ;;  %v304_v24 = vld [vmem:[%s1172_s2 + $0xc0] sm:$0xff] (!%p229_p9)  ;;  %v305_v25 = vld [vmem:[%s1172_s2 + $0xc8] sm:$0xff] (!%p229_p9) }
  0x15   : > { %763 = vmatprep.subr.bf16.mxu0 (!%p229_p9), %v762_v12  ;;  %v770_v23 = vpack.c.bf16 (!%p229_p9), %v287_v21, %v286_v20  ;;  %v288_v27 = vld [vmem:[%s1172_s2 + $0x40] sm:$0xff] (!%p229_p9)  ;;  %v289_v28 = vld [vmem:[%s1172_s2 + $0x48] sm:$0xff] (!%p229_p9)  ;;  %v742_v30 = vpack.c.bf16 (!%p229_p9), %v305_v25, %v304_v24  ;;  %v306_v32 = vld [vmem:[%s1172_s2 + $0xd0] sm:$0xff] (!%p229_p9) }
  0x16   : > { %v774_v31 = vpack.c.bf16 (!%p229_p9), %v289_v28, %v288_v27  ;;  %v307_v33 = vld [vmem:[%s1172_s2 + $0xd8] sm:$0xff] (!%p229_p9)  ;;  %v290_v34 = vld [vmem:[%s1172_s2 + $0x50] sm:$0xff] (!%p229_p9)  ;;  %v308_v38 = vld [vmem:[%s1172_s2 + $0xe0] sm:$0xff] (!%p229_p9) }
  0x17   : > { %s1184_s16 = smov (!%p264_p10, %s606_s16), 3  ;;  %733 = vmatpush3.bf16.msra.mxu1 %v730_v8  ;;  %v291_v35 = vld [vmem:[%s1172_s2 + $0x58] sm:$0xff]  ;;  %v746_v36 = vpack.c.bf16 %v307_v33, %v306_v32  ;;  %v309_v39 = vld [vmem:[%s1172_s2 + $0xe8] sm:$0xff]  ;;  %v292_v40 = vld [vmem:[%s1172_s2 + $0x60] sm:$0xff] }
  0x18   : > { %s607_s20 = sshll.u32 %s1184_s16, 3  ;;  %765 = vmatpush3.bf16.msra.mxu0 %v762_v12  ;;  %735 = vmatprep.subr.bf16.mxu1 %v734_v16  ;;  %v778_v37 = vpack.c.bf16 %v291_v35, %v290_v34  ;;  %v293_v41 = vld [vmem:[%s1172_s2 + $0x68] sm:$0xff]  ;;  %v750_v42 = vpack.c.bf16 %v309_v39, %v308_v38  ;;  %v310_v44 = vld [vmem:[%s1172_s2 + $0xf0] sm:$0xff]  ;;  %v311_v45 = vld [vmem:[%s1172_s2 + $0xf8] sm:$0xff] }
  0x19   : > { %s1046_s14 = scalar_lea.vmem %s1171_s1, %s607_s20  ;;  %s1051_s18 = scalar_lea.vmem %s1170_s0, %s607_s20  ;;  %767 = vmatprep.subr.bf16.mxu0 %v766_v17  ;;  %v782_v43 = vpack.c.bf16 %v293_v41, %v292_v40  ;;  %v294_v46 = vld [vmem:[%s1172_s2 + $0x70] sm:$0xff]  ;;  %v295_v47 = vld [vmem:[%s1172_s2 + $0x78] sm:$0xff]  ;;  %v754_v48 = vpack.c.bf16 %v311_v45, %v310_v44  ;;  %v610_v54 = vld [vmem:[%s1173_s3] ss:$0 sm:$0xff] }
  0x1a   : > { %v1060_v26 = vld [vmem:[%s1046_s14] sm:$0xff]  ;;  %v786_v49 = vpack.c.bf16 %v295_v47, %v294_v46  ;;  %v279_v50 = vld [vmem:[%s1046_s14 + $0x8] sm:$0xff]  ;;  %s489_s14 = sld [smem:[#allocation2]] }
  0x1b   : > { %688 = vmatprep.mubr.f32.mxu1 %v1060_v26  ;;  %v1070_v29 = vld [vmem:[%s1051_s18] sm:$0xff]  ;;  %737 = vmatpush3.bf16.msra.mxu1 %v734_v16  ;;  %v277_v51 = vld [vmem:[%s1051_s18 + $0x8] sm:$0xff]  ;;  %s260_s18 = sand.u32 1, %s895_s24  }
  0x1c   : > { %723 = vmatprep.mubr.f32.mxu0 %v1070_v29  ;;  %769 = vmatpush3.bf16.msra.mxu0 %v766_v17  ;;  %v611_v61 = vld [vmem:[%s1174_s4] ss:$0 sm:$0xff]  ;;  %v505_v15 = vsub.f32 %v1070_v29, %v1060_v26  ;;  %s605_s11 = sshll.u32 %s260_s18, 4  ;;  %v506_v17 = vsub.f32 %v277_v51, %v279_v50  ;;  %s1129_s21 = scalar_lea.sflag [#allocation4], %s260_s18 }
  0x1d   : > { %739 = vmatprep.subr.bf16.mxu1 %v738_v22  ;;  %771 = vmatprep.subr.bf16.mxu0 %v770_v23  ;;  %s262_s13 = scalar_lea.vmem [#allocation3], %s605_s11 }
  0x1e   : > { %s527_s16 = sshll.u32 %s262_s13, 4  ;;  %s1127_s16 = int_to_ptr.vmem [resolvable:$true] %s527_s16 }
  0x1f   : > { %741 = vmatpush3.bf16.msra.mxu1 %v738_v22  ;;  %s841_s5 = scalar_lea.vmem %s1127_s16, 256  ;;  %p848_p0 = scmp.lt.s32.totalorder %s1127_s16, %s846_s27 }
  0x20   : > { %773 = vmatpush3.bf16.msra.mxu0 %v770_v23  ;;  %743 = vmatprep.subr.bf16.mxu1 %v742_v30  ;;  %v490_v4 = vstv %s489_s14  ;;  %p842_p11 = scmp.ne.s32.totalorder %s1127_s16, %s841_s5  ;;  %p849_p1 = scmp.lt.s32.totalorder %s847_s29, %s841_s5 }
  0x21   : > { %775 = vmatprep.subr.bf16.mxu0 %v774_v31 }
  0x22   : > { %p843_p12 = pnand %p842_p11, %p984_p5  ;;  %p850_p2 = por %p849_p1, %p848_p0 }
  0x23   : > { %745 = vmatpush3.bf16.msra.mxu1 %v742_v30 }
  0x24   : > { %777 = vmatpush3.bf16.msra.mxu0 %v774_v31  ;;  %747 = vmatprep.subr.bf16.mxu1 %v746_v36  ;;  %p844_p13 = pneg %p843_p12 }
  0x25   : > { %779 = vmatprep.subr.bf16.mxu0 %v778_v37 }
  0x26   : > { %p851_p3 = pnand %p850_p2, %p844_p13 }
  0x27   : > { %749 = vmatpush3.bf16.msra.mxu1 %v746_v36 }
  0x28   : > { %781 = vmatpush3.bf16.msra.mxu0 %v778_v37  ;;  %751 = vmatprep.subr.bf16.mxu1 %v750_v42 }
  0x29   : > { %783 = vmatprep.subr.bf16.mxu0 %v782_v43 }
  0x2b   : > { %753 = vmatpush3.bf16.msra.mxu1 %v750_v42 }
  0x2c   : > { %785 = vmatpush3.bf16.msra.mxu0 %v782_v43  ;;  %755 = vmatprep.subr.bf16.mxu1 %v754_v48 }
  0x2d   : > { %787 = vmatprep.subr.bf16.mxu0 %v786_v49 }
  0x2f   : > { %757 = vmatpush3.bf16.msra.mxu1 %v754_v48 }
  0x30   : > { %789 = vmatpush3.bf16.msra.mxu0 %v786_v49 }
  0x32   : > { %689 = vmatmul.mubr.f32.vlgmr.msra.gmra.mrb[0].mxu1 %v279_v50 }
  0x33   : > { %724 = vmatmul.mubr.f32.vlgmr.msra.gmra.mrb[0].mxu0 %v277_v51 }
 0x105   : > { %v690_v52 = vpop.f32.mrb[0].mxu1 }
 0x106   : > { %v725_v53 = vpop.f32.mrb[0].mxu0  ;;  %v378_v55 = vpop.f32.mrb[1].mxu1 }
 0x107   : > { %v459_v56 = vadd.f32 %v725_v53, %v690_v52  ;;  %v453_v57 = vpop.f32.mrb[1].mxu0 }
 0x108   : > { %v454_v58 = vadd.f32 %v453_v57, %v378_v55 }
 0x109   : > { %v470_v59 = vadd.f32 %v610_v54, %v459_v56 }
 0x10a   : > { %v469_v60 = vadd.f32 %v610_v54, %v454_v58 }
 0x10b   : > { %v472_v62 = vmax.f32 %v470_v59, 0.0 }
 0x10c   : > { %v471_v63 = vmax.f32 %v469_v60, 0.0 }
 0x10d   : > { %v481_v2 = vmul.f32 %v611_v61, %v472_v62 }
 0x10e   : > { %v480_v0 = vmul.f32 %v611_v61, %v471_v63 }
 0x10f   : > { %v486_v3 = vsel %vm482_vm0, %v481_v2, 0.0 }
 0x110   : > { %v483_v1 = vsel %vm482_vm0, %v480_v0, 0.0 }
 0x111   : > { %484 = vadd.xlane.f32.xlu0 %v483_v1 }
 0x115   : > { %487 = vadd.xlane.f32.xlu0 %v486_v3 }
 0x19e   : > { %v485_v5 = vpop.xlane.xlu0 %484 }
 0x19f   : > { %v491_v6 = vadd.f32 %v490_v4, %v485_v5 }
 0x1a1   : > { %v612_v7 = vmul.f32 -1.442695, %v491_v6 }
 0x1a2   : > { %v488_v8 = vpop.xlane.xlu0 %487 }
 0x1a3   : > { %833 = vpow2.f32 %v612_v7  ;;  %v492_v9 = vadd.f32 %v490_v4, %v488_v8 }
 0x1a5   : > { %v613_v10 = vmul.f32 -1.442695, %v492_v9 }
 0x1a7   : > { %835 = vpow2.f32 %v613_v10 }
 0x1ad   : > { %v834_v11 = vpop.eup %833 }
 0x1ae   : > { %v499_v12 = vadd.f32 1.0, %v834_v11 }
 0x1b0   : > { %837 = vrcp.f32 %v499_v12 }
 0x1b1   : > { %v836_v13 = vpop.eup %835 }
 0x1b2   : > { %v500_v14 = vadd.f32 1.0, %v836_v13 }
 0x1b4   : > { %839 = vrcp.f32 %v500_v14 }
 0x1ba   : > { %v838_v16 = vpop.eup %837 }
 0x1bb   : > { %v507_v18 = vmul.f32 %v838_v16, %v505_v15 }
 0x1bd   : > { %v509_v19 = vadd.f32 %v507_v18, %v1060_v26 }
 0x1be   : > { %v840_v20 = vpop.eup %839 }
 0x1bf   : > { %v508_v21 = vmul.f32 %v840_v20, %v506_v17  ;;  %511 = vst [vmem:[%s262_s13] sm:$0xff] %v509_v19 }
 0x1c1   : > { %v510_v22 = vadd.f32 %v508_v21, %v279_v50 }
 0x1c3   : > { %512 = vst [vmem:[%s262_s13 + $0x8] sm:$0xff] %v510_v22 }
 0x1c4   : > { %854 = shalt.err (!%p851_p3)
}
 0x1c5   : > { %s855_s30 = scalar_lea.hbm %s1125_s19, 256  ;;  %s859_s14 = scalar_lea.hbm %s1176_s6, 512 }
 0x1c6   : > { %p856_p4 = scmp.ne.s32.totalorder %s1125_s19, %s855_s30  ;;  %p860_p9 = scmp.lt.u32.totalorder %s1125_s19, %s1176_s6 }
 0x1c7   : > { %p861_p10 = scmp.lt.u32.totalorder %s859_s14, %s855_s30  ;;  %p863_p12 = scmp.lt.u32.totalorder %s855_s30, %s1125_s19 }
 0x1c8   : > { %p857_p7 = pnand %p856_p4, %p984_p5 }
 0x1c9   : > { %p862_p11 = por %p861_p10, %p860_p9 }
 0x1ca   : > { %p858_p8 = pneg %p857_p7 }
 0x1cb   : > { %p864_p13 = por %p863_p12, %p862_p11 }
 0x1cd   : > { %p865_p0 = pnand %p864_p13, %p858_p8 }
 0x1cf   : > { %868 = shalt.err (!%p865_p0)
}
 0x1d0   : > { %s906_s12 = smov 128   ;;  %s907_s13 = smov 8  }
 0x1d1   : > { %792 = dma.vmem_to_hbm [thread:$0]  (%p984_p5), %s1127_s16, 256, %s1125_s19, %s1129_s21, %s906_s12, %s906_s12, %s907_s13  }
 0x1d2 PF: > { %p798_p1 = scmp.ge.s32.totalorder %s903_s26, 2  ;;  %s542_s15 = sand.u32 1, %s891_s23  }
 0x1d3   : > { %s543_s17 = scalar_lea.sflag [#allocation4], %s542_s15 }
 0x1d4   : > { %p795_p2 = pnand %p798_p1, %p988_p6 }
 0x1d6   : > { %886 = dma.done.wait (!%p795_p2), %s543_s17, 256  }
 0x1d7   : > { %888 = vsyncadd (!%p795_p2), %s543_s17, 4294967040  ;;  %p17_p3 = scmp.ge.s32.totalorder %s971_s28, 4   ;;  %s1179_s23 = smov %s895_s24 }
 0x1d8   : > { %s1180_s24 = smov %s899_s25  ;;  %s1181_s25 = smov %s982_s7 }
 0x1d9   : > { %s1182_s26 = smov %s971_s28  ;;  %19 = sbr.rel (!%p17_p3) target bundleno = 5 (0x5), region = 82 }
 0x1e0   :  { %548 = vsyncpa [#allocation4], 1 }
 0x1e1   :  { %550 = vsyncpa [#allocation4 + $0x1], 1 }

</bundles_post_ra>
